<compile_context>
chip_gen: v5e
topology: v5e:2x2
jax: 0.10.0
libtpu: 0.0.40
codegen_flags: <defaults>
</compile_context>

<pallas_src>
import jax
import jax.numpy as jnp
from jax.experimental import pallas as pl
from jax.experimental.pallas import tpu as pltpu

INPUT_DIM = 784          # isMNIST = True
H1, H2, OUT = 256, 128, 10
OUT_PAD = 128            # lane-dense output slab (multiple of 128); sliced to 10 outside

_SPLIT_BATCH = 512       # above this, force >= 2 tiles so v7x megacore uses both TCs


def _round_up(x, m):
    return ((x + m - 1) // m) * m


def _pick_tile(B, tb):
    """Batch tile: full batch for small B; otherwise a multiple of 8 with >= 2 tiles
    once B >= _SPLIT_BATCH (so the "parallel" grid axis can shard across v7x cores)."""
    if B <= tb and B < _SPLIT_BATCH:
        return B                              # single block == full array (no 8-row constraint)
    half = _round_up((B + 1) // 2, 8)         # ceil(B/2) rounded to sublane multiple
    t = min(tb, half)
    return max(8, (t // 8) * 8)


def mlp_kernel(x_ref, w1_ref, b1_ref, w2_ref, b2_ref, w3_ref, b3_ref, o_ref):
    # Whole 3-layer MLP for one (tb, 784) batch tile.
    # f32 tile -> bf16 on the VPU, bf16 operands feed the MXU, f32 accumulation,
    # bias add + ReLU on the VPU in f32.
    x = x_ref[...].astype(jnp.bfloat16)                                   # (tb, 784)
    h1 = jnp.dot(x, w1_ref[...], preferred_element_type=jnp.float32) + b1_ref[...]
    h1 = jnp.maximum(h1, 0.0).astype(jnp.bfloat16)
    h2 = jnp.dot(h1, w2_ref[...], preferred_element_type=jnp.float32) + b2_ref[...]
    h2 = jnp.maximum(h2, 0.0).astype(jnp.bfloat16)
    o = jnp.dot(h2, w3_ref[...], preferred_element_type=jnp.float32) + b3_ref[...]
    o_ref[...] = o.astype(o_ref.dtype)                                    # (tb, 128) dense bf16 store


def prepare_params(params):
    """One-time conversion of f32 PyTorch-style params into kernel-ready arrays
    (bf16 weights, f32 biases, 10->128 lane padding on the last layer)."""
    w3 = jnp.zeros((H2, OUT_PAD), jnp.bfloat16).at[:, :OUT].set(params["w3"].astype(jnp.bfloat16))
    b3 = jnp.zeros((1, OUT_PAD), jnp.float32).at[:, :OUT].set(params["b3"].astype(jnp.float32))
    return {
        "w1": params["w1"].astype(jnp.bfloat16),
        "b1": params["b1"].astype(jnp.float32),
        "w2": params["w2"].astype(jnp.bfloat16),
        "b2": params["b2"].astype(jnp.float32),
        "w3": w3,
        "b3": b3,
    }


def baseline_model_forward(x, prep, *, tb=1024):
    """x: (B, INPUT_DIM) float32. prep: output of prepare_params. Returns (B, 10) f32."""
    B, D = x.shape
    assert D == INPUT_DIM

    tb_eff = _pick_tile(B, tb)
    grid = pl.cdiv(B, tb_eff)   # ragged last tile handled by Pallas (masked writes)

    # Grid-invariant index_map -> weights/biases stay resident in VMEM across steps.
    # (pl.Buffered(1) would also drop their second buffer, but headroom is ample.)
    full = lambda shape: pl.BlockSpec(shape, lambda i: (0, 0))

    out = pl.pallas_call(
        mlp_kernel,
        out_shape=jax.ShapeDtypeStruct((B, OUT_PAD), jnp.bfloat16),
        grid_spec=pltpu.PrefetchScalarGridSpec(
            num_scalar_prefetch=0,
            grid=(grid,),
            in_specs=[
                pl.BlockSpec((tb_eff, INPUT_DIM), lambda i: (i, 0)),  # f32 x tile: the only per-step DMA
                full((INPUT_DIM, H1)),                                # w1 (bf16)
                full((1, H1)),                                        # b1 (f32)
                full((H1, H2)),                                       # w2 (bf16)
                full((1, H2)),                                        # b2 (f32)
                full((H2, OUT_PAD)),                                  # w3 (bf16, lane-padded)
                full((1, OUT_PAD)),                                   # b3 (f32, lane-padded)
            ],
            out_specs=pl.BlockSpec((tb_eff, OUT_PAD), lambda i: (i, 0)),
        ),
        compiler_params=pltpu.CompilerParams(
            dimension_semantics=("parallel",),      # batch tiles shard across TCs on v7x megacore
            vmem_limit_bytes=32 * 1024 * 1024,      # covers f32 x tile @ tb=1024 on v5e's 16MiB default
        ),
    )(x, prep["w1"], prep["b1"], prep["w2"], prep["b2"], prep["w3"], prep["b3"])

    # Tiny (B, 10) slice + f32 cast; fuses with the pallas call consumer under jit.
    return out[:, :OUT].astype(jnp.float32)


def init_params(key):
    """Deterministic init mimicking nn.Linear default (U[-1/sqrt(fan_in), 1/sqrt(fan_in)])."""
    ks = jax.random.split(key, 6)

    def linear(kw, kb, fan_in, fan_out):
        bound = 1.0 / (fan_in ** 0.5)
        w = jax.random.uniform(kw, (fan_in, fan_out), jnp.float32, -bound, bound)
        b = jax.random.uniform(kb, (1, fan_out), jnp.float32, -bound, bound)
        return w, b

    w1, b1 = linear(ks[0], ks[1], INPUT_DIM, H1)
    w2, b2 = linear(ks[2], ks[3], H1, H2)
    w3, b3 = linear(ks[4], ks[5], H2, OUT)
    return {"w1": w1, "b1": b1, "w2": w2, "b2": b2, "w3": w3, "b3": b3}


def reference_forward_f32(x, p):
    h1 = jnp.maximum(x @ p["w1"] + p["b1"], 0.0)
    h2 = jnp.maximum(h1 @ p["w2"] + p["b2"], 0.0)
    return h2 @ p["w3"] + p["b3"]


def reference_forward_bf16(x, p):
    # Mirrors the kernel's numerics: bf16 matmul inputs, f32 accumulation,
    # f32 bias/ReLU, bf16 output store.
    bf, f32 = jnp.bfloat16, jnp.float32
    h1 = jnp.dot(x.astype(bf), p["w1"].astype(bf), preferred_element_type=f32) + p["b1"]
    h1 = jnp.maximum(h1, 0.0).astype(bf)
    h2 = jnp.dot(h1, p["w2"].astype(bf), preferred_element_type=f32) + p["b2"]
    h2 = jnp.maximum(h2, 0.0).astype(bf)
    o = jnp.dot(h2, p["w3"].astype(bf), preferred_element_type=f32) + p["b3"]
    return o.astype(bf).astype(f32)


if __name__ == "__main__":
    key = jax.random.PRNGKey(0)
    kx, kp = jax.random.split(key)
    params = init_params(kp)
    prep = prepare_params(params)          # one-time param prep, reused across calls

    fwd = jax.jit(baseline_model_forward, static_argnames=("tb",))

    # Small demo batch: single grid step, block == full batch, no padding anywhere.
    B = 16
    x = jax.random.normal(kx, (B, INPUT_DIM), dtype=jnp.float32)
    out = jax.block_until_ready(fwd(x, prep))
    assert out.shape == (B, OUT)
    assert jnp.allclose(out, reference_forward_bf16(x, params), atol=1e-2, rtol=1e-2)
    assert jnp.allclose(out, reference_forward_f32(x, params), atol=1e-1, rtol=1e-1)

    # Ragged batch with a small forced tile: multi-step grid + partial (masked) last tile.
    B2 = 20
    x2 = jax.random.normal(jax.random.PRNGKey(1), (B2, INPUT_DIM), dtype=jnp.float32)
    out2 = jax.block_until_ready(fwd(x2, prep, tb=8))
    assert out2.shape == (B2, OUT)
    assert jnp.allclose(out2, reference_forward_bf16(x2, params), atol=1e-2, rtol=1e-2)

    print("KERNEL_OK")
</pallas_src>

<mosaic_0001>
module attributes {stable_mosaic.version = 11 : i64} {
  func.func @mlp_kernel(%arg0: i32, %arg1: memref<16x784xf32, #tpu.memory_space<vmem>>, %arg2: memref<784x256xbf16, #tpu.memory_space<vmem>>, %arg3: memref<1x256xf32, #tpu.memory_space<vmem>>, %arg4: memref<256x128xbf16, #tpu.memory_space<vmem>>, %arg5: memref<1x128xf32, #tpu.memory_space<vmem>>, %arg6: memref<128x128xbf16, #tpu.memory_space<vmem>>, %arg7: memref<1x128xf32, #tpu.memory_space<vmem>>, %arg8: memref<16x128xbf16, #tpu.memory_space<vmem>>) attributes {dimension_semantics = [#tpu.dimension_semantics<parallel>], iteration_bounds = array<i64: 1>, scalar_prefetch = 0 : i64, scratch_operands = 0 : i64, tpu.core_type = #tpu.core_type<tc>, window_params = [{transform_indices = @transform_0, window_bounds = array<i64: 16, 784>}, {pipeline_mode = #tpu.pipeline_mode<synchronous>, transform_indices = @transform_1, window_bounds = array<i64: 784, 256>}, {pipeline_mode = #tpu.pipeline_mode<synchronous>, transform_indices = @transform_2, window_bounds = array<i64: 1, 256>}, {pipeline_mode = #tpu.pipeline_mode<synchronous>, transform_indices = @transform_3, window_bounds = array<i64: 256, 128>}, {pipeline_mode = #tpu.pipeline_mode<synchronous>, transform_indices = @transform_4, window_bounds = array<i64: 1, 128>}, {pipeline_mode = #tpu.pipeline_mode<synchronous>, transform_indices = @transform_5, window_bounds = array<i64: 128, 128>}, {pipeline_mode = #tpu.pipeline_mode<synchronous>, transform_indices = @transform_6, window_bounds = array<i64: 1, 128>}, {transform_indices = @transform_7, window_bounds = array<i64: 16, 128>}]} {
    %c0 = arith.constant 0 : index
    %c0_0 = arith.constant 0 : index
    %0 = vector.load %arg1[%c0, %c0_0] : memref<16x784xf32, #tpu.memory_space<vmem>>, vector<16x784xf32>
    %1 = arith.truncf %0 : vector<16x784xf32> to vector<16x784xbf16>
    %c0_1 = arith.constant 0 : index
    %c0_2 = arith.constant 0 : index
    %2 = vector.load %arg2[%c0_1, %c0_2] : memref<784x256xbf16, #tpu.memory_space<vmem>>, vector<784x256xbf16>
    %cst = arith.constant dense<0.000000e+00> : vector<16x256xf32>
    %3 = tpu.matmul %1, %2, %cst {dimension_numbers = #tpu.dot_dimension_numbers<[1], [0], [0], [1], [0, 0, 1, 1], [], []>} : vector<16x784xbf16>, vector<784x256xbf16>, vector<16x256xf32> -> vector<16x256xf32>
    %c0_3 = arith.constant 0 : index
    %c0_4 = arith.constant 0 : index
    %4 = vector.load %arg3[%c0_3, %c0_4] : memref<1x256xf32, #tpu.memory_space<vmem>>, vector<1x256xf32>
    %5 = vector.broadcast %4 : vector<1x256xf32> to vector<16x256xf32>
    %6 = arith.addf %3, %5 : vector<16x256xf32>
    %cst_5 = arith.constant 0.000000e+00 : f32
    %7 = vector.broadcast %cst_5 : f32 to vector<16x256xf32>
    %8 = arith.maximumf %6, %7 : vector<16x256xf32>
    %9 = arith.truncf %8 : vector<16x256xf32> to vector<16x256xbf16>
    %c0_6 = arith.constant 0 : index
    %c0_7 = arith.constant 0 : index
    %10 = vector.load %arg4[%c0_6, %c0_7] : memref<256x128xbf16, #tpu.memory_space<vmem>>, vector<256x128xbf16>
    %cst_8 = arith.constant dense<0.000000e+00> : vector<16x128xf32>
    %11 = tpu.matmul %9, %10, %cst_8 {dimension_numbers = #tpu.dot_dimension_numbers<[1], [0], [0], [1], [0, 0, 1, 1], [], []>} : vector<16x256xbf16>, vector<256x128xbf16>, vector<16x128xf32> -> vector<16x128xf32>
    %c0_9 = arith.constant 0 : index
    %c0_10 = arith.constant 0 : index
    %12 = vector.load %arg5[%c0_9, %c0_10] : memref<1x128xf32, #tpu.memory_space<vmem>>, vector<1x128xf32>
    %13 = vector.broadcast %12 : vector<1x128xf32> to vector<16x128xf32>
    %14 = arith.addf %11, %13 : vector<16x128xf32>
    %cst_11 = arith.constant 0.000000e+00 : f32
    %15 = vector.broadcast %cst_11 : f32 to vector<16x128xf32>
    %16 = arith.maximumf %14, %15 : vector<16x128xf32>
    %17 = arith.truncf %16 : vector<16x128xf32> to vector<16x128xbf16>
    %c0_12 = arith.constant 0 : index
    %c0_13 = arith.constant 0 : index
    %18 = vector.load %arg6[%c0_12, %c0_13] : memref<128x128xbf16, #tpu.memory_space<vmem>>, vector<128x128xbf16>
    %cst_14 = arith.constant dense<0.000000e+00> : vector<16x128xf32>
    %19 = tpu.matmul %17, %18, %cst_14 {dimension_numbers = #tpu.dot_dimension_numbers<[1], [0], [0], [1], [0, 0, 1, 1], [], []>} : vector<16x128xbf16>, vector<128x128xbf16>, vector<16x128xf32> -> vector<16x128xf32>
    %c0_15 = arith.constant 0 : index
    %c0_16 = arith.constant 0 : index
    %20 = vector.load %arg7[%c0_15, %c0_16] : memref<1x128xf32, #tpu.memory_space<vmem>>, vector<1x128xf32>
    %21 = vector.broadcast %20 : vector<1x128xf32> to vector<16x128xf32>
    %22 = arith.addf %19, %21 : vector<16x128xf32>
    %23 = arith.truncf %22 : vector<16x128xf32> to vector<16x128xbf16>
    %c0_17 = arith.constant 0 : index
    %c0_18 = arith.constant 0 : index
    %24 = vector.load %arg8[%c0_17, %c0_18] : memref<16x128xbf16, #tpu.memory_space<vmem>>, vector<16x128xbf16>
    tpu.vector_store %arg8[%c0_17, %c0_18], %23 {strides = array<i32>} : memref<16x128xbf16, #tpu.memory_space<vmem>>, vector<16x128xbf16>,
    return
  }
  func.func @transform_0(%arg0: i32) -> (i32, i32) {
    %c0_i32 = arith.constant 0 : i32
    %c0_i32_0 = arith.constant 0 : i32
    return %arg0, %c0_i32 : i32, i32
  }
  func.func @transform_1(%arg0: i32) -> (i32, i32) {
    %c0_i32 = arith.constant 0 : i32
    %c0_i32_0 = arith.constant 0 : i32
    %c0_i32_1 = arith.constant 0 : i32
    return %c0_i32, %c0_i32_0 : i32, i32
  }
  func.func @transform_2(%arg0: i32) -> (i32, i32) {
    %c0_i32 = arith.constant 0 : i32
    %c0_i32_0 = arith.constant 0 : i32
    %c0_i32_1 = arith.constant 0 : i32
    return %c0_i32, %c0_i32_0 : i32, i32
  }
  func.func @transform_3(%arg0: i32) -> (i32, i32) {
    %c0_i32 = arith.constant 0 : i32
    %c0_i32_0 = arith.constant 0 : i32
    %c0_i32_1 = arith.constant 0 : i32
    return %c0_i32, %c0_i32_0 : i32, i32
  }
  func.func @transform_4(%arg0: i32) -> (i32, i32) {
    %c0_i32 = arith.constant 0 : i32
    %c0_i32_0 = arith.constant 0 : i32
    %c0_i32_1 = arith.constant 0 : i32
    return %c0_i32, %c0_i32_0 : i32, i32
  }
  func.func @transform_5(%arg0: i32) -> (i32, i32) {
    %c0_i32 = arith.constant 0 : i32
    %c0_i32_0 = arith.constant 0 : i32
    %c0_i32_1 = arith.constant 0 : i32
    return %c0_i32, %c0_i32_0 : i32, i32
  }
  func.func @transform_6(%arg0: i32) -> (i32, i32) {
    %c0_i32 = arith.constant 0 : i32
    %c0_i32_0 = arith.constant 0 : i32
    %c0_i32_1 = arith.constant 0 : i32
    return %c0_i32, %c0_i32_0 : i32, i32
  }
  func.func @transform_7(%arg0: i32) -> (i32, i32) {
    %c0_i32 = arith.constant 0 : i32
    %c0_i32_0 = arith.constant 0 : i32
    return %arg0, %c0_i32 : i32, i32
  }
}

</mosaic_0001>

<bundles_post_ra>
// kernel: baseline_model_forward.1
= control target key start
LH: loop header
LB: loop body
LE: loop exit
PB: predicated region body
PF: predicated region fallthrough
CT: control target
= control target key end

     0   :  { %12 = vsyncpa [#allocation3], 0  ;;  %s2045_s0 = inlined_call_operand.hbm [shape: f32[16,784], index: 0, kind: input, shape index: {}]   ;;  %s2046_s1 = inlined_call_operand.hbm [shape: bf16[784,256], index: 1, kind: input, shape index: {}]   ;;  %s2047_s2 = inlined_call_operand.hbm [shape: f32[1,256], index: 2, kind: input, shape index: {}]   ;;  %s2048_s3 = inlined_call_operand.hbm [shape: bf16[256,128], index: 3, kind: input, shape index: {}]   ;;  %s2049_s4 = inlined_call_operand.vmem [shape: f32[1,128], index: 4, kind: input, shape index: {}]   ;;  %s2050_s5 = inlined_call_operand.hbm [shape: bf16[128,128], index: 5, kind: input, shape index: {}]   ;;  %s2051_s6 = inlined_call_operand.vmem [shape: f32[1,128], index: 6, kind: input, shape index: {}]   ;;  %s2052_s7 = inlined_call_operand.vmem [shape: bf16[16,128], index: 7, kind: output, shape index: {}]  }
   0x1   :  { %13 = vsyncpa [#allocation5], 0  ;;  %s32_s26 = sshll.u32 %s2046_s1, 4  ;;  %s33_s26 = int_to_ptr.hbm [resolvable:$true] %s32_s26 }
   0x2   :  { %14 = vsyncpa [#allocation8], 0  ;;  %s1936_s27 = smov [#allocation4]   ;;  %s56_s8 = sshll.u32 %s2048_s3, 4  ;;  %s57_s8 = int_to_ptr.hbm [resolvable:$true] %s56_s8 }
   0x3   :  { %s34_s28 = sshll.u32 %s1936_s27, 4  ;;  %s1937_s9 = smov 128   ;;  %s35_s28 = int_to_ptr.vmem [resolvable:$true] %s34_s28 }
   0x4   :  { %s1938_s10 = smov 8   ;;  %s1939_s11 = smov [#allocation7]  }
   0x5   :  { %40 = dma.hbm_to_vmem [thread:$0]  %s33_s26, 12544, %s35_s28, [#allocation5], %s1937_s9, %s1937_s9, %s1938_s10  }
   0x6   :  { %s58_s12 = sshll.u32 %s1939_s11, 4  ;;  %s1940_s13 = smov 64   ;;  %s59_s12 = int_to_ptr.vmem [resolvable:$true] %s58_s12 }
   0x7   :  { %s1941_s14 = smov 4   ;;  %s19_s16 = sshll.u32 %s2045_s0, 4  ;;  %s20_s16 = int_to_ptr.hbm [resolvable:$true] %s19_s16 }
   0x8   :  { %64 = dma.hbm_to_vmem [thread:$0]  %s57_s8, 2048, %s59_s12, [#allocation8], %s1940_s13, %s1940_s13, %s1941_s14  }
   0x9   :  { %s1942_s17 = smov [#allocation2]   ;;  %s46_s20 = sshll.u32 %s2047_s2, 4  ;;  %s47_s20 = int_to_ptr.hbm [resolvable:$true] %s46_s20 }
   0xa   :  { %s21_s18 = sshll.u32 %s1942_s17, 4  ;;  %s1943_s21 = smov 896   ;;  %s22_s18 = int_to_ptr.vmem [resolvable:$true] %s21_s18 }
   0xb   :  { %s1944_s22 = smov 56   ;;  %s1945_s23 = smov [#allocation6]  }
   0xc   :  { %27 = dma.hbm_to_vmem [thread:$0]  %s20_s16, 1792, %s22_s18, [#allocation3], %s1943_s21, %s1943_s21, %s1944_s22  }
   0xd   :  { %s48_s24 = sshll.u32 %s1945_s23, 4  ;;  %s71_s27 = sshll.u32 %s2050_s5, 4  ;;  %s49_s24 = int_to_ptr.vmem [resolvable:$true] %s48_s24  ;;  %s72_s27 = int_to_ptr.hbm [resolvable:$true] %s71_s27 }
   0xe   :  { %51 = dma.hbm_to_vmem [thread:$0]  %s47_s20, 32, %s49_s24, [#allocation5]  }
   0xf   :  { %s1946_s0 = smov [#allocation9]  }
  0x10   :  { %s73_s28 = sshll.u32 %s1946_s0, 4  ;;  %s74_s28 = int_to_ptr.vmem [resolvable:$true] %s73_s28 }
  0x11   :  { %79 = dma.hbm_to_vmem [thread:$0]  %s72_s27, 1024, %s74_s28, [#allocation8], %s1940_s13, %s1940_s13, %s1941_s14  }
  0x12   :  { %1930 = dma.done.wait [#allocation3], 1792  }
  0x13   :  { %1931 = vsyncadd [#allocation3], 4294965504 }
  0x14   :  { %1932 = dma.done.wait [#allocation5], 12576  }
  0x15   :  { %1933 = vsyncadd [#allocation5], 4294954720 }
  0x16   :  { %1934 = dma.done.wait [#allocation8], 3072  }
  0x17   :  { %1935 = vsyncadd [#allocation8], 4294964224  ;;  %v1238_v0 = vld [vmem:[#allocation4 + $0x70] sm:$0xf]  ;;  %v1685_v1 = vld [vmem:[#allocation4 + $0x74] sm:$0xf0] }
  0x18   :  { %v1366_v2 = vld [vmem:[#allocation4 + $0x170] sm:$0xf]  ;;  %v1239_v3 = vor.u32 %v1685_v1, %v1238_v0  ;;  %v1717_v4 = vld [vmem:[#allocation4 + $0x174] sm:$0xf0]  ;;  %v1230_v11 = vld [vmem:[#allocation4 + $0x60] sm:$0xf] }
  0x19   :  { %v1430_v5 = vld [vmem:[#allocation4 + $0x1f0] sm:$0xf]  ;;  %v1733_v6 = vld [vmem:[#allocation4 + $0x1f4] sm:$0xf0]  ;;  %v1367_v7 = vor.u32 %v1717_v4, %v1366_v2  ;;  %v1683_v13 = vld [vmem:[#allocation4 + $0x64] sm:$0xf0] }
  0x1a   :  { %v1431_v8 = vor.u32 %v1733_v6, %v1430_v5  ;;  %v1302_v9 = vld [vmem:[#allocation4 + $0xf0] sm:$0xf]  ;;  %v1701_v10 = vld [vmem:[#allocation4 + $0xf4] sm:$0xf0]  ;;  %722 = vmatpush.bf16.msra.mxu0 %v1239_v3  ;;  %v1358_v14 = vld [vmem:[#allocation4 + $0x160] sm:$0xf]  ;;  %v1231_v16 = vor.u32 %v1683_v13, %v1230_v11 }
  0x1b   :  { %v1303_v12 = vor.u32 %v1701_v10, %v1302_v9  ;;  %v1715_v15 = vld [vmem:[#allocation4 + $0x164] sm:$0xf0]  ;;  %750 = vmatpush.bf16.msra.mxu2 %v1367_v7  ;;  %v1422_v18 = vld [vmem:[#allocation4 + $0x1e0] sm:$0xf]  ;;  %v1222_v23 = vld [vmem:[#allocation4 + $0x50] sm:$0xf] }
  0x1c   :  { %764 = vmatpush.bf16.msra.mxu3 %v1431_v8  ;;  %v1359_v17 = vor.u32 %v1715_v15, %v1358_v14  ;;  %v1731_v19 = vld [vmem:[#allocation4 + $0x1e4] sm:$0xf0]  ;;  %v1294_v20 = vld [vmem:[#allocation4 + $0xe0] sm:$0xf]  ;;  %v1681_v24 = vld [vmem:[#allocation4 + $0x54] sm:$0xf0] }
  0x1d   :  { %736 = vmatpush.bf16.msra.mxu1 %v1303_v12  ;;  %v1423_v21 = vor.u32 %v1731_v19, %v1422_v18  ;;  %v1699_v22 = vld [vmem:[#allocation4 + $0xe4] sm:$0xf0]  ;;  %v1350_v26 = vld [vmem:[#allocation4 + $0x150] sm:$0xf]  ;;  %v1713_v27 = vld [vmem:[#allocation4 + $0x154] sm:$0xf0]  ;;  %v1223_v29 = vor.u32 %v1681_v24, %v1222_v23 }
  0x1e   :  { %v1295_v25 = vor.u32 %v1699_v22, %v1294_v20  ;;  %v1414_v28 = vld [vmem:[#allocation4 + $0x1d0] sm:$0xf]  ;;  %723 = vmatpush.bf16.msra.mxu0 %v1231_v16  ;;  %v1729_v30 = vld [vmem:[#allocation4 + $0x1d4] sm:$0xf0]  ;;  %v1351_v33 = vor.u32 %v1713_v27, %v1350_v26  ;;  %v1214_v35 = vld [vmem:[#allocation4 + $0x40] sm:$0xf] }
  0x1f   :  { %v1286_v31 = vld [vmem:[#allocation4 + $0xd0] sm:$0xf]  ;;  %v1697_v32 = vld [vmem:[#allocation4 + $0xd4] sm:$0xf0]  ;;  %751 = vmatpush.bf16.msra.mxu2 %v1359_v17  ;;  %v1415_v34 = vor.u32 %v1729_v30, %v1414_v28  ;;  %v1679_v36 = vld [vmem:[#allocation4 + $0x44] sm:$0xf0] }
  0x20   :  { %765 = vmatpush.bf16.msra.mxu3 %v1423_v21  ;;  %v1342_v37 = vld [vmem:[#allocation4 + $0x140] sm:$0xf]  ;;  %v1287_v38 = vor.u32 %v1697_v32, %v1286_v31  ;;  %v1711_v39 = vld [vmem:[#allocation4 + $0x144] sm:$0xf0]  ;;  %v1215_v44 = vor.u32 %v1679_v36, %v1214_v35  ;;  %v1206_v47 = vld [vmem:[#allocation4 + $0x30] sm:$0xf] }
  0x21   :  { %737 = vmatpush.bf16.msra.mxu1 %v1295_v25  ;;  %v1406_v40 = vld [vmem:[#allocation4 + $0x1c0] sm:$0xf]  ;;  %v1727_v41 = vld [vmem:[#allocation4 + $0x1c4] sm:$0xf0]  ;;  %v1343_v45 = vor.u32 %v1711_v39, %v1342_v37  ;;  %v1677_v48 = vld [vmem:[#allocation4 + $0x34] sm:$0xf0] }
  0x22   :  { %v1278_v42 = vld [vmem:[#allocation4 + $0xc0] sm:$0xf]  ;;  %v1695_v43 = vld [vmem:[#allocation4 + $0xc4] sm:$0xf0]  ;;  %724 = vmatpush.bf16.msra.mxu0 %v1223_v29  ;;  %v1407_v46 = vor.u32 %v1727_v41, %v1406_v40  ;;  %v1334_v49 = vld [vmem:[#allocation4 + $0x130] sm:$0xf]  ;;  %v1207_v56 = vor.u32 %v1677_v48, %v1206_v47 }
  0x23   :  { %752 = vmatpush.bf16.msra.mxu2 %v1351_v33  ;;  %v1279_v50 = vor.u32 %v1695_v43, %v1278_v42  ;;  %v1709_v51 = vld [vmem:[#allocation4 + $0x134] sm:$0xf0]  ;;  %v1398_v52 = vld [vmem:[#allocation4 + $0x1b0] sm:$0xf]  ;;  %v1198_v59 = vld [vmem:[#allocation4 + $0x20] sm:$0xf] }
  0x24   :  { %766 = vmatpush.bf16.msra.mxu3 %v1415_v34  ;;  %v1725_v53 = vld [vmem:[#allocation4 + $0x1b4] sm:$0xf0]  ;;  %v1270_v54 = vld [vmem:[#allocation4 + $0xb0] sm:$0xf]  ;;  %v1335_v57 = vor.u32 %v1709_v51, %v1334_v49  ;;  %v1675_v60 = vld [vmem:[#allocation4 + $0x24] sm:$0xf0] }
  0x25   :  { %738 = vmatpush.bf16.msra.mxu1 %v1287_v38  ;;  %v1693_v55 = vld [vmem:[#allocation4 + $0xb4] sm:$0xf0]  ;;  %v1399_v58 = vor.u32 %v1725_v53, %v1398_v52  ;;  %v1326_v61 = vld [vmem:[#allocation4 + $0x120] sm:$0xf]  ;;  %v1707_v63 = vld [vmem:[#allocation4 + $0x124] sm:$0xf0]  ;;  %v1199_v4 = vor.u32 %v1675_v60, %v1198_v59 }
  0x26   :  { %725 = vmatpush.bf16.msra.mxu0 %v1215_v44  ;;  %v1271_v62 = vor.u32 %v1693_v55, %v1270_v54  ;;  %v1390_v0 = vld [vmem:[#allocation4 + $0x1a0] sm:$0xf]  ;;  %v1723_v1 = vld [vmem:[#allocation4 + $0x1a4] sm:$0xf0]  ;;  %v1190_v5 = vld [vmem:[#allocation4 + $0x10] sm:$0xf]  ;;  %v1327_v6 = vor.u32 %v1707_v63, %v1326_v61 }
  0x27   :  { %753 = vmatpush.bf16.msra.mxu2 %v1343_v45  ;;  %v1262_v2 = vld [vmem:[#allocation4 + $0xa0] sm:$0xf]  ;;  %v1691_v3 = vld [vmem:[#allocation4 + $0xa4] sm:$0xf0]  ;;  %v1391_v7 = vor.u32 %v1723_v1, %v1390_v0  ;;  %v1673_v8 = vld [vmem:[#allocation4 + $0x14] sm:$0xf0] }
  0x28   :  { %767 = vmatpush.bf16.msra.mxu3 %v1407_v46  ;;  %v1318_v9 = vld [vmem:[#allocation4 + $0x110] sm:$0xf]  ;;  %v1705_v10 = vld [vmem:[#allocation4 + $0x114] sm:$0xf0]  ;;  %v1263_v11 = vor.u32 %v1691_v3, %v1262_v2  ;;  %v1182_v16 = vld [vmem:[#allocation4] sm:$0xf]  ;;  %v1191_v18 = vor.u32 %v1673_v8, %v1190_v5 }
  0x29   :  { %739 = vmatpush.bf16.msra.mxu1 %v1279_v50  ;;  %v1382_v12 = vld [vmem:[#allocation4 + $0x190] sm:$0xf]  ;;  %v1721_v13 = vld [vmem:[#allocation4 + $0x194] sm:$0xf0]  ;;  %v1671_v17 = vld [vmem:[#allocation4 + $0x4] sm:$0xf0]  ;;  %v1319_v23 = vor.u32 %v1705_v10, %v1318_v9 }
  0x2a   :  { %726 = vmatpush.bf16.msra.mxu0 %v1207_v56  ;;  %v1254_v14 = vld [vmem:[#allocation4 + $0x90] sm:$0xf]  ;;  %v1689_v15 = vld [vmem:[#allocation4 + $0x94] sm:$0xf0]  ;;  %v1310_v19 = vld [vmem:[#allocation4 + $0x100] sm:$0xf]  ;;  %v1383_v24 = vor.u32 %v1721_v13, %v1382_v12  ;;  %v1183_v35 = vor.u32 %v1671_v17, %v1182_v16 }
  0x2b   :  { %754 = vmatpush.bf16.msra.mxu2 %v1335_v57  ;;  %v1703_v20 = vld [vmem:[#allocation4 + $0x104] sm:$0xf0]  ;;  %v1374_v21 = vld [vmem:[#allocation4 + $0x180] sm:$0xf]  ;;  %v1494_v25 = vld [vmem:[#allocation4 + $0x270] sm:$0xf]  ;;  %v1255_v28 = vor.u32 %v1689_v15, %v1254_v14 }
  0x2c   :  { %768 = vmatpush.bf16.msra.mxu3 %v1399_v58  ;;  %v1719_v22 = vld [vmem:[#allocation4 + $0x184] sm:$0xf0]  ;;  %v1749_v26 = vld [vmem:[#allocation4 + $0x274] sm:$0xf0]  ;;  %v1684_v27 = vld [vmem:[#allocation4 + $0x74] sm:$0xf]  ;;  %v1311_v39 = vor.u32 %v1703_v20, %v1310_v19 }
  0x2d   :  { %740 = vmatpush.bf16.msra.mxu1 %v1271_v62  ;;  %v1240_v29 = vld [vmem:[#allocation4 + $0x78] sm:$0xf0]  ;;  %v1246_v30 = vld [vmem:[#allocation4 + $0x80] sm:$0xf]  ;;  %v1687_v31 = vld [vmem:[#allocation4 + $0x84] sm:$0xf0]  ;;  %v1375_v40 = vor.u32 %v1719_v22, %v1374_v21  ;;  %v1495_v44 = vor.u32 %v1749_v26, %v1494_v25 }
  0x2e   :  { %727 = vmatpush.bf16.msra.mxu0 %v1199_v4  ;;  %v105_v32 = vld [vmem:[#allocation2 + $0x10] sm:$0xff]  ;;  %v112_v33 = vld [vmem:[#allocation2 + $0x48] sm:$0xff]  ;;  %v1558_v34 = vld [vmem:[#allocation4 + $0x2f0] sm:$0xf]  ;;  %v1243_v45 = vor.u32 %v1684_v27, %v1240_v29  ;;  %v1247_v49 = vor.u32 %v1687_v31, %v1246_v30  ;;  %vm718_vm0 = vcmask 130048  }
  0x2f   :  { %755 = vmatpush.bf16.msra.mxu2 %v1327_v6  ;;  %v1765_v36 = vld [vmem:[#allocation4 + $0x2f4] sm:$0xf0]  ;;  %v1566_v37 = vld [vmem:[#allocation4 + $0x300] sm:$0xf]  ;;  %v1767_v38 = vld [vmem:[#allocation4 + $0x304] sm:$0xf0]  ;;  %v2002_v54 = vpack.c.bf16 %v112_v33, %v105_v32 }
  0x30   :  { %769 = vmatpush.bf16.msra.mxu3 %v1391_v7  ;;  %v1700_v41 = vld [vmem:[#allocation4 + $0xf4] sm:$0xf]  ;;  %v1304_v42 = vld [vmem:[#allocation4 + $0xf8] sm:$0xf0]  ;;  %v110_v46 = vld [vmem:[#allocation2 + $0x38] sm:$0xff]  ;;  %v1567_v50 = vor.u32 %v1767_v38, %v1566_v37  ;;  %v1559_v55 = vor.u32 %v1765_v36, %v1558_v34 }
  0x31   :  { %741 = vmatpush.bf16.msra.mxu1 %v1263_v11  ;;  %v103_v43 = vld [vmem:[#allocation2] sm:$0xff]  ;;  %v106_v47 = vld [vmem:[#allocation2 + $0x18] sm:$0xff]  ;;  %v113_v48 = vld [vmem:[#allocation2 + $0x50] sm:$0xff]  ;;  %v1307_v59 = vor.u32 %v1700_v41, %v1304_v42 }
  0x32   :  { %728 = vmatpush.bf16.msra.mxu0 %v1191_v18  ;;  %v1486_v51 = vld [vmem:[#allocation4 + $0x260] sm:$0xf]  ;;  %v1747_v52 = vld [vmem:[#allocation4 + $0x264] sm:$0xf0]  ;;  %v1682_v53 = vld [vmem:[#allocation4 + $0x64] sm:$0xf]  ;;  %v2004_v60 = vpack.c.bf16 %v110_v46, %v103_v43  ;;  %v2006_v63 = vpack.c.bf16 %v113_v48, %v106_v47 }
  0x33   :  { %756 = vmatpush.bf16.msra.mxu2 %v1319_v23  ;;  %v1232_v56 = vld [vmem:[#allocation4 + $0x68] sm:$0xf0]  ;;  %v104_v57 = vld [vmem:[#allocation2 + $0x8] sm:$0xff]  ;;  %v111_v58 = vld [vmem:[#allocation2 + $0x40] sm:$0xff]  ;;  %v1487_v0 = vor.u32 %v1747_v52, %v1486_v51 }
  0x34   :  { %770 = vmatpush.bf16.msra.mxu3 %v1383_v24  ;;  %v1550_v61 = vld [vmem:[#allocation4 + $0x2e0] sm:$0xf]  ;;  %v1763_v62 = vld [vmem:[#allocation4 + $0x2e4] sm:$0xf0]  ;;  %v1698_v1 = vld [vmem:[#allocation4 + $0xe4] sm:$0xf]  ;;  %v1235_v3 = vor.u32 %v1682_v53, %v1232_v56  ;;  %v2008_v4 = vpack.c.bf16 %v111_v58, %v104_v57 }
  0x35   :  { %742 = vmatpush.bf16.msra.mxu1 %v1255_v28  ;;  %v1296_v2 = vld [vmem:[#allocation4 + $0xe8] sm:$0xf0]  ;;  %v1478_v5 = vld [vmem:[#allocation4 + $0x250] sm:$0xf]  ;;  %v1745_v6 = vld [vmem:[#allocation4 + $0x254] sm:$0xf0]  ;;  %v1551_v7 = vor.u32 %v1763_v62, %v1550_v61 }
  0x36   :  { %729 = vmatpush.bf16.msra.mxu0 %v1183_v35  ;;  %v1680_v8 = vld [vmem:[#allocation4 + $0x54] sm:$0xf]  ;;  %v1224_v9 = vld [vmem:[#allocation4 + $0x58] sm:$0xf0]  ;;  %v1299_v10 = vor.u32 %v1698_v1, %v1296_v2  ;;  %v1542_v11 = vld [vmem:[#allocation4 + $0x2d0] sm:$0xf]  ;;  %v1479_v13 = vor.u32 %v1745_v6, %v1478_v5 }
  0x37   :  { %757 = vmatpush.bf16.msra.mxu2 %v1311_v39  ;;  %v1761_v12 = vld [vmem:[#allocation4 + $0x2d4] sm:$0xf0]  ;;  %v1696_v14 = vld [vmem:[#allocation4 + $0xd4] sm:$0xf]  ;;  %v1288_v15 = vld [vmem:[#allocation4 + $0xd8] sm:$0xf0]  ;;  %v1227_v16 = vor.u32 %v1680_v8, %v1224_v9 }
  0x38   :  { %771 = vmatpush.bf16.msra.mxu3 %v1375_v40  ;;  %v1470_v17 = vld [vmem:[#allocation4 + $0x240] sm:$0xf]  ;;  %v1743_v18 = vld [vmem:[#allocation4 + $0x244] sm:$0xf0]  ;;  %v1543_v19 = vor.u32 %v1761_v12, %v1542_v11  ;;  %v1678_v20 = vld [vmem:[#allocation4 + $0x44] sm:$0xf]  ;;  %v1291_v22 = vor.u32 %v1696_v14, %v1288_v15 }
  0x39   :  { %743 = vmatpush.bf16.msra.mxu1 %v1247_v49  ;;  %730 = vmatmul.bf16.vlgmr.msra.gmra.mxu0 %v2004_v60  ;;  %v1216_v21 = vld [vmem:[#allocation4 + $0x48] sm:$0xf0]  ;;  %v1534_v23 = vld [vmem:[#allocation4 + $0x2c0] sm:$0xf]  ;;  %v1759_v24 = vld [vmem:[#allocation4 + $0x2c4] sm:$0xf0]  ;;  %v1471_v25 = vor.u32 %v1743_v18, %v1470_v17 }
  0x3a   :  { %778 = vmatpush.bf16.msrb.mxu0 %v1495_v44  ;;  %758 = vmatmul.bf16.vlgmr.msra.gmra.mxu2 %v2002_v54  ;;  %v1694_v26 = vld [vmem:[#allocation4 + $0xc4] sm:$0xf]  ;;  %v1280_v27 = vld [vmem:[#allocation4 + $0xc8] sm:$0xf0]  ;;  %v1219_v28 = vor.u32 %v1678_v20, %v1216_v21  ;;  %v1462_v29 = vld [vmem:[#allocation4 + $0x230] sm:$0xf]  ;;  %v1535_v31 = vor.u32 %v1759_v24, %v1534_v23 }
  0x3b   :  { %813 = vmatpush.bf16.msrb.mxu2 %v1567_v50  ;;  %772 = vmatmul.bf16.vlgmr.msra.gmra.mxu3 %v2006_v63  ;;  %v1741_v30 = vld [vmem:[#allocation4 + $0x234] sm:$0xf0]  ;;  %v1676_v32 = vld [vmem:[#allocation4 + $0x34] sm:$0xf]  ;;  %v1208_v33 = vld [vmem:[#allocation4 + $0x38] sm:$0xf0]  ;;  %v1283_v35 = vor.u32 %v1694_v26, %v1280_v27 }
  0x3c   :  { %820 = vmatpush.bf16.msrb.mxu3 %v1243_v45  ;;  %744 = vmatmul.bf16.vlgmr.msra.gmra.mxu1 %v2008_v4  ;;  %v1526_v34 = vld [vmem:[#allocation4 + $0x2b0] sm:$0xf]  ;;  %v1757_v36 = vld [vmem:[#allocation4 + $0x2b4] sm:$0xf0]  ;;  %v109_v37 = vld [vmem:[#allocation2 + $0x30] sm:$0xff]  ;;  %v1463_v39 = vor.u32 %v1741_v30, %v1462_v29  ;;  %v1211_v42 = vor.u32 %v1676_v32, %v1208_v33 }
  0x3d   :  { %792 = vmatpush.bf16.msrb.mxu1 %v1559_v55  ;;  %v116_v38 = vld [vmem:[#allocation2 + $0x68] sm:$0xff]  ;;  %v1692_v40 = vld [vmem:[#allocation4 + $0xb4] sm:$0xf]  ;;  %v1454_v43 = vld [vmem:[#allocation4 + $0x220] sm:$0xf]  ;;  %v1527_v45 = vor.u32 %v1757_v36, %v1526_v34 }
  0x3e   :  { %779 = vmatpush.bf16.msrb.mxu0 %v1487_v0  ;;  %v1272_v41 = vld [vmem:[#allocation4 + $0xb8] sm:$0xf0]  ;;  %v1739_v44 = vld [vmem:[#allocation4 + $0x224] sm:$0xf0]  ;;  %v1674_v46 = vld [vmem:[#allocation4 + $0x24] sm:$0xf]  ;;  %v2014_v48 = vpack.c.bf16 %v116_v38, %v109_v37 }
  0x3f   :  { %834 = vmatpush.bf16.msra.mxu2 %v1307_v59  ;;  %v1200_v47 = vld [vmem:[#allocation4 + $0x28] sm:$0xf0]  ;;  %v1275_v49 = vor.u32 %v1692_v40, %v1272_v41  ;;  %v1518_v50 = vld [vmem:[#allocation4 + $0x2a0] sm:$0xf]  ;;  %v1755_v51 = vld [vmem:[#allocation4 + $0x2a4] sm:$0xf0]  ;;  %v1455_v52 = vor.u32 %v1739_v44, %v1454_v43 }
  0x40   :  { %821 = vmatpush.bf16.msrb.mxu3 %v1235_v3  ;;  %v1690_v53 = vld [vmem:[#allocation4 + $0xa4] sm:$0xf]  ;;  %v1264_v55 = vld [vmem:[#allocation4 + $0xa8] sm:$0xf0]  ;;  %v1203_v56 = vor.u32 %v1674_v46, %v1200_v47  ;;  %v1446_v57 = vld [vmem:[#allocation4 + $0x210] sm:$0xf]  ;;  %v1519_v61 = vor.u32 %v1755_v51, %v1518_v50 }
  0x41   :  { %793 = vmatpush.bf16.msrb.mxu1 %v1551_v7  ;;  %v1737_v58 = vld [vmem:[#allocation4 + $0x214] sm:$0xf0]  ;;  %v1672_v59 = vld [vmem:[#allocation4 + $0x14] sm:$0xf]  ;;  %v1192_v62 = vld [vmem:[#allocation4 + $0x18] sm:$0xf0]  ;;  %v1267_v2 = vor.u32 %v1690_v53, %v1264_v55 }
  0x42   :  { %780 = vmatpush.bf16.msrb.mxu0 %v1479_v13  ;;  %v1510_v0 = vld [vmem:[#allocation4 + $0x290] sm:$0xf]  ;;  %v1753_v1 = vld [vmem:[#allocation4 + $0x294] sm:$0xf0]  ;;  %v1688_v3 = vld [vmem:[#allocation4 + $0x94] sm:$0xf]  ;;  %v1447_v7 = vor.u32 %v1737_v58, %v1446_v57  ;;  %v1195_v11 = vor.u32 %v1672_v59, %v1192_v62 }
  0x43   :  { %835 = vmatpush.bf16.msra.mxu2 %v1299_v10  ;;  %v1256_v5 = vld [vmem:[#allocation4 + $0x98] sm:$0xf0]  ;;  %v1438_v6 = vld [vmem:[#allocation4 + $0x200] sm:$0xf]  ;;  %v1735_v8 = vld [vmem:[#allocation4 + $0x204] sm:$0xf0]  ;;  %v1511_v15 = vor.u32 %v1753_v1, %v1510_v0 }
  0x44   :  { %822 = vmatpush.bf16.msrb.mxu3 %v1227_v16  ;;  %v1670_v9 = vld [vmem:[#allocation4 + $0x4] sm:$0xf]  ;;  %v1184_v10 = vld [vmem:[#allocation4 + $0x8] sm:$0xf0]  ;;  %v1716_v12 = vld [vmem:[#allocation4 + $0x174] sm:$0xf]  ;;  %v1439_v23 = vor.u32 %v1735_v8, %v1438_v6 }
  0x45   :  { %794 = vmatpush.bf16.msrb.mxu1 %v1543_v19  ;;  %v1368_v13 = vld [vmem:[#allocation4 + $0x178] sm:$0xf0]  ;;  %v1748_v14 = vld [vmem:[#allocation4 + $0x274] sm:$0xf]  ;;  %v1502_v17 = vld [vmem:[#allocation4 + $0x280] sm:$0xf]  ;;  %v1259_v19 = vor.u32 %v1688_v3, %v1256_v5  ;;  %v1187_v27 = vor.u32 %v1670_v9, %v1184_v10 }
  0x46   :  { %781 = vmatpush.bf16.msrb.mxu0 %v1471_v25  ;;  %v1496_v16 = vld [vmem:[#allocation4 + $0x278] sm:$0xf0]  ;;  %v1751_v18 = vld [vmem:[#allocation4 + $0x284] sm:$0xf0]  ;;  %v107_v20 = vld [vmem:[#allocation2 + $0x20] sm:$0xff] }
  0x47   :  { %836 = vmatpush.bf16.msra.mxu2 %v1291_v22  ;;  %v114_v21 = vld [vmem:[#allocation2 + $0x58] sm:$0xff]  ;;  %v1686_v22 = vld [vmem:[#allocation4 + $0x84] sm:$0xf]  ;;  %v1732_v25 = vld [vmem:[#allocation4 + $0x1f4] sm:$0xf]  ;;  %v1499_v32 = vor.u32 %v1748_v14, %v1496_v16  ;;  %v1503_v33 = vor.u32 %v1751_v18, %v1502_v17 }
  0x48   :  { %823 = vmatpush.bf16.msrb.mxu3 %v1219_v28  ;;  %v1248_v24 = vld [vmem:[#allocation4 + $0x88] sm:$0xf0]  ;;  %v1432_v26 = vld [vmem:[#allocation4 + $0x1f8] sm:$0xf0]  ;;  %v1371_v28 = vor.u32 %v1716_v12, %v1368_v13  ;;  %v1764_v29 = vld [vmem:[#allocation4 + $0x2f4] sm:$0xf]  ;;  %v2018_v37 = vpack.c.bf16 %v114_v21, %v107_v20 }
  0x49   :  { %795 = vmatpush.bf16.msrb.mxu1 %v1535_v31  ;;  %v1560_v30 = vld [vmem:[#allocation4 + $0x2f8] sm:$0xf0]  ;;  %v115_v34 = vld [vmem:[#allocation2 + $0x60] sm:$0xff]  ;;  %v1360_v36 = vld [vmem:[#allocation4 + $0x168] sm:$0xf0]  ;;  %v1251_v38 = vor.u32 %v1686_v22, %v1248_v24  ;;  %v1435_v41 = vor.u32 %v1732_v25, %v1432_v26 }
  0x4a   :  { %782 = vmatpush.bf16.msrb.mxu0 %v1463_v39  ;;  %1572 = vmatmul.msk.bf16.vlgmr.msrb.gmra.mxu2 %vm718_vm0, %v2014_v48  ;;  %v108_v31 = vld [vmem:[#allocation2 + $0x28] sm:$0xff]  ;;  %v1746_v39 = vld [vmem:[#allocation4 + $0x264] sm:$0xf]  ;;  %v1488_v40 = vld [vmem:[#allocation4 + $0x268] sm:$0xf0] }
  0x4b   :  { %837 = vmatpush.bf16.msra.mxu2 %v1283_v35  ;;  %v1714_v35 = vld [vmem:[#allocation4 + $0x164] sm:$0xf]  ;;  %v2020_v44 = vpack.c.bf16 %v115_v34, %v108_v31  ;;  %v1424_v46 = vld [vmem:[#allocation4 + $0x1e8] sm:$0xf0]  ;;  %v1491_v50 = vor.u32 %v1746_v39, %v1488_v40  ;;  %v1712_v51 = vld [vmem:[#allocation4 + $0x154] sm:$0xf] }
  0x4c   :  { %824 = vmatpush.bf16.msrb.mxu3 %v1211_v42  ;;  %v1563_v42 = vor.u32 %v1764_v29, %v1560_v30  ;;  %v1730_v43 = vld [vmem:[#allocation4 + $0x1e4] sm:$0xf]  ;;  %v1744_v53 = vld [vmem:[#allocation4 + $0x254] sm:$0xf]  ;;  %v1480_v55 = vld [vmem:[#allocation4 + $0x258] sm:$0xf0] }
  0x4d   :  { %796 = vmatpush.bf16.msrb.mxu1 %v1527_v45  ;;  %v1363_v45 = vor.u32 %v1714_v35, %v1360_v36  ;;  %v1762_v47 = vld [vmem:[#allocation4 + $0x2e4] sm:$0xf]  ;;  %v1728_v58 = vld [vmem:[#allocation4 + $0x1d4] sm:$0xf]  ;;  %v1544_v0 = vld [vmem:[#allocation4 + $0x2d8] sm:$0xf0]  ;;  %v1483_v1 = vor.u32 %v1744_v53, %v1480_v55 }
  0x4e   :  { %783 = vmatpush.bf16.msrb.mxu0 %v1455_v52  ;;  %v1352_v52 = vld [vmem:[#allocation4 + $0x158] sm:$0xf0]  ;;  %v1760_v62 = vld [vmem:[#allocation4 + $0x2d4] sm:$0xf]  ;;  %v1344_v3 = vld [vmem:[#allocation4 + $0x148] sm:$0xf0] }
  0x4f   :  { %838 = vmatpush.bf16.msra.mxu2 %v1275_v49  ;;  %v1552_v49 = vld [vmem:[#allocation4 + $0x2e8] sm:$0xf0]  ;;  %v1355_v59 = vor.u32 %v1712_v51, %v1352_v52  ;;  %v1742_v5 = vld [vmem:[#allocation4 + $0x244] sm:$0xf]  ;;  %v1547_v8 = vor.u32 %v1760_v62, %v1544_v0  ;;  %v1740_v16 = vld [vmem:[#allocation4 + $0x234] sm:$0xf] }
  0x50   :  { %825 = vmatpush.bf16.msrb.mxu3 %v1203_v56  ;;  %v1427_v56 = vor.u32 %v1730_v43, %v1424_v46  ;;  %v1555_v57 = vor.u32 %v1762_v47, %v1552_v49  ;;  %v1472_v6 = vld [vmem:[#allocation4 + $0x248] sm:$0xf0]  ;;  %v1726_v9 = vld [vmem:[#allocation4 + $0x1c4] sm:$0xf]  ;;  %v1464_v17 = vld [vmem:[#allocation4 + $0x238] sm:$0xf0] }
  0x51   :  { %797 = vmatpush.bf16.msrb.mxu1 %v1519_v61  ;;  %v1416_v61 = vld [vmem:[#allocation4 + $0x1d8] sm:$0xf0]  ;;  %v1408_v10 = vld [vmem:[#allocation4 + $0x1c8] sm:$0xf0]  ;;  %v1475_v14 = vor.u32 %v1742_v5, %v1472_v6  ;;  %v1756_v22 = vld [vmem:[#allocation4 + $0x2b4] sm:$0xf]  ;;  %v1467_v24 = vor.u32 %v1740_v16, %v1464_v17 }
  0x52   :  { %784 = vmatpush.bf16.msrb.mxu0 %v1447_v7  ;;  %v1419_v7 = vor.u32 %v1728_v58, %v1416_v61  ;;  %v1536_v13 = vld [vmem:[#allocation4 + $0x2c8] sm:$0xf0]  ;;  %v1400_v21 = vld [vmem:[#allocation4 + $0x1b8] sm:$0xf0]  ;;  %v1706_v25 = vld [vmem:[#allocation4 + $0x124] sm:$0xf] }
  0x53   :  { %839 = vmatpush.bf16.msra.mxu2 %v1267_v2  ;;  %v1710_v2 = vld [vmem:[#allocation4 + $0x144] sm:$0xf]  ;;  %v1328_v26 = vld [vmem:[#allocation4 + $0x128] sm:$0xf0]  ;;  %v1320_v39 = vld [vmem:[#allocation4 + $0x118] sm:$0xf0] }
  0x54   :  { %826 = vmatpush.bf16.msrb.mxu3 %v1195_v11  ;;  %v1758_v11 = vld [vmem:[#allocation4 + $0x2c4] sm:$0xf]  ;;  %v1347_v12 = vor.u32 %v1710_v2, %v1344_v3  ;;  %v1520_v35 = vld [vmem:[#allocation4 + $0x2a8] sm:$0xf0]  ;;  %v1736_v40 = vld [vmem:[#allocation4 + $0x214] sm:$0xf] }
  0x55   :  { %798 = vmatpush.bf16.msrb.mxu1 %v1511_v15  ;;  %v1708_v15 = vld [vmem:[#allocation4 + $0x134] sm:$0xf]  ;;  %v1539_v18 = vor.u32 %v1758_v11, %v1536_v13  ;;  %v1722_v31 = vld [vmem:[#allocation4 + $0x1a4] sm:$0xf]  ;;  %v1384_v47 = vld [vmem:[#allocation4 + $0x198] sm:$0xf0] }
  0x56   :  { %785 = vmatpush.bf16.msrb.mxu0 %v1439_v23  ;;  %v1528_v23 = vld [vmem:[#allocation4 + $0x2b8] sm:$0xf0]  ;;  %v1754_v34 = vld [vmem:[#allocation4 + $0x2a4] sm:$0xf]  ;;  %v1752_v49 = vld [vmem:[#allocation4 + $0x294] sm:$0xf] }
  0x57   :  { %840 = vmatpush.bf16.msra.mxu2 %v1259_v19  ;;  %v1724_v19 = vld [vmem:[#allocation4 + $0x1b4] sm:$0xf]  ;;  %v1531_v30 = vor.u32 %v1756_v22, %v1528_v23  ;;  %v1523_v43 = vor.u32 %v1754_v34, %v1520_v35  ;;  %v1702_v52 = vld [vmem:[#allocation4 + $0x104] sm:$0xf]  ;;  %v1312_v53 = vld [vmem:[#allocation4 + $0x108] sm:$0xf0] }
  0x58   :  { %827 = vmatpush.bf16.msrb.mxu3 %v1187_v27  ;;  %v1738_v27 = vld [vmem:[#allocation4 + $0x224] sm:$0xf]  ;;  %v1403_v29 = vor.u32 %v1724_v19, %v1400_v21  ;;  %v1376_v62 = vld [vmem:[#allocation4 + $0x188] sm:$0xf0]  ;;  %v1773_v11 = vld [vmem:[#allocation7 + $0x28] sm:$0xff] }
  0x59   :  { %799 = vmatpush.bf16.msrb.mxu1 %v1503_v33  ;;  %786 = vmatmul.bf16.vlgmr.msrb.gmra.mxu0 %v2018_v37  ;;  %v1392_v33 = vld [vmem:[#allocation4 + $0x1a8] sm:$0xf0]  ;;  %v1734_v55 = vld [vmem:[#allocation4 + $0x204] sm:$0xf]  ;;  %v1769_v13 = vld [vmem:[#allocation7 + $0x8] sm:$0xff] }
  0x5a   :  { %848 = vmatpush.bf16.msra.mxu0 %v1371_v28  ;;  %v1456_v28 = vld [vmem:[#allocation4 + $0x228] sm:$0xf0]  ;;  %v1718_v61 = vld [vmem:[#allocation4 + $0x184] sm:$0xf] }
  0x5b   :  { %841 = vmatpush.bf16.msra.mxu2 %v1251_v38  ;;  %828 = vmatmul.bf16.vlgmr.msrb.gmra.mxu3 %v2004_v60  ;;  %v1411_v60 = vor.u32 %v1726_v9, %v1408_v10  ;;  %v1459_v36 = vor.u32 %v1738_v27, %v1456_v28  ;;  %v1704_v38 = vld [vmem:[#allocation4 + $0x114] sm:$0xf]  ;;  %v1504_v2 = vld [vmem:[#allocation4 + $0x288] sm:$0xf0]  ;;  %v1766_v3 = vld [vmem:[#allocation4 + $0x304] sm:$0xf]  ;;  %v1379_v6 = vor.u32 %v1718_v61, %v1376_v62 }
  0x5c   :  { %876 = vmatpush.bf16.msra.mxu3 %v1499_v32  ;;  %800 = vmatmul.bf16.vlgmr.msrb.gmra.mxu1 %v2020_v44  ;;  %v1331_v32 = vor.u32 %v1706_v25, %v1328_v26  ;;  %v1323_v46 = vor.u32 %v1704_v38, %v1320_v39  ;;  %v1568_v5 = vld [vmem:[#allocation4 + $0x308] sm:$0xf0]  ;;  %v1774_v10 = vld [vmem:[#allocation7 + $0x30] sm:$0xff] }
  0x5d   :  { %862 = vmatpush.bf16.msra.mxu1 %v1435_v41  ;;  %v1448_v41 = vld [vmem:[#allocation4 + $0x218] sm:$0xf0]  ;;  %v1775_v9 = vld [vmem:[#allocation7 + $0x38] sm:$0xff] }
  0x5e   :  { %849 = vmatpush.bf16.msra.mxu0 %v1363_v45  ;;  %842 = vmatmul.bf16.vlgmr.msra.gmra.mxu2 %v2008_v4  ;;  %v1336_v4 = vld [vmem:[#allocation4 + $0x138] sm:$0xf0]  ;;  %v1720_v45 = vld [vmem:[#allocation4 + $0x194] sm:$0xf]  ;;  %v1451_v51 = vor.u32 %v1736_v40, %v1448_v41 }
  0x5f   :  { %890 = vmatpush.bf16.msrb.mxu2 %v1563_v42  ;;  %v1339_v20 = vor.u32 %v1708_v15, %v1336_v4  ;;  %v1395_v42 = vor.u32 %v1722_v31, %v1392_v33  ;;  %v1768_v15 = vld [vmem:[#allocation7] sm:$0xff]  ;;  %v1783_v31 = vld [vmem:[#allocation7 + $0x78] sm:$0xff] }
  0x60   :  { %877 = vmatpush.bf16.msra.mxu3 %v1491_v50  ;;  %v1512_v50 = vld [vmem:[#allocation4 + $0x298] sm:$0xf0] }
  0x61   :  { %863 = vmatpush.bf16.msra.mxu1 %v1427_v56  ;;  %v1440_v56 = vld [vmem:[#allocation4 + $0x208] sm:$0xf0]  ;;  %v1515_v58 = vor.u32 %v1752_v49, %v1512_v50 }
  0x62   :  { %850 = vmatpush.bf16.msra.mxu0 %v1355_v59  ;;  %v1315_v59 = vor.u32 %v1702_v52, %v1312_v53  ;;  %v1443_v0 = vor.u32 %v1734_v55, %v1440_v56  ;;  %v1778_v52 = vld [vmem:[#allocation7 + $0x50] sm:$0xff]  ;;  %v1777_v55 = vld [vmem:[#allocation7 + $0x48] sm:$0xff] }
  0x63   :  { %891 = vmatpush.bf16.msrb.mxu2 %v1555_v57  ;;  %v1387_v57 = vor.u32 %v1720_v45, %v1384_v47  ;;  %v1780_v47 = vld [vmem:[#allocation7 + $0x60] sm:$0xff] }
  0x64   :  { %878 = vmatpush.bf16.msra.mxu3 %v1483_v1  ;;  %v1750_v1 = vld [vmem:[#allocation4 + $0x284] sm:$0xf] }
  0x65   :  { %864 = vmatpush.bf16.msra.mxu1 %v1419_v7  ;;  %v1507_v7 = vor.u32 %v1750_v1, %v1504_v2 }
  0x66   :  { %851 = vmatpush.bf16.msra.mxu0 %v1347_v12  ;;  %v1772_v12 = vld [vmem:[#allocation7 + $0x20] sm:$0xff] }
  0x67   :  { %892 = vmatpush.bf16.msrb.mxu2 %v1547_v8  ;;  %v1571_v8 = vor.u32 %v1766_v3, %v1568_v5 }
  0x68   :  { %879 = vmatpush.bf16.msra.mxu3 %v1475_v14 }
  0x69   :  { %865 = vmatpush.bf16.msra.mxu1 %v1411_v60 }
  0x6a   :  { %852 = vmatpush.bf16.msra.mxu0 %v1339_v20 }
  0x6b   :  { %893 = vmatpush.bf16.msrb.mxu2 %v1539_v18 }
  0x6c   :  { %880 = vmatpush.bf16.msra.mxu3 %v1467_v24 }
  0x6d   :  { %866 = vmatpush.bf16.msra.mxu1 %v1403_v29 }
  0x6e   :  { %853 = vmatpush.bf16.msra.mxu0 %v1331_v32 }
  0x6f   :  { %894 = vmatpush.bf16.msrb.mxu2 %v1531_v30 }
  0x70   :  { %881 = vmatpush.bf16.msra.mxu3 %v1459_v36  ;;  %v1782_v36 = vld [vmem:[#allocation7 + $0x70] sm:$0xff] }
  0x71   :  { %867 = vmatpush.bf16.msra.mxu1 %v1395_v42 }
  0x72   :  { %854 = vmatpush.bf16.msra.mxu0 %v1323_v46 }
  0x73   :  { %895 = vmatpush.bf16.msrb.mxu2 %v1523_v43  ;;  %v1781_v43 = vld [vmem:[#allocation7 + $0x68] sm:$0xff] }
  0x74   :  { %882 = vmatpush.bf16.msra.mxu3 %v1451_v51  ;;  %v1779_v51 = vld [vmem:[#allocation7 + $0x58] sm:$0xff] }
  0x75   :  { %868 = vmatpush.bf16.msra.mxu1 %v1387_v57  ;;  %v1776_v57 = vld [vmem:[#allocation7 + $0x40] sm:$0xff] }
  0x76   :  { %855 = vmatpush.bf16.msra.mxu0 %v1315_v59 }
  0x77   :  { %896 = vmatpush.bf16.msrb.mxu2 %v1515_v58 }
  0x78   :  { %883 = vmatpush.bf16.msra.mxu3 %v1443_v0 }
  0x79   :  { %869 = vmatpush.bf16.msra.mxu1 %v1379_v6  ;;  %856 = vmatmul.bf16.vlgmr.msra.gmra.mxu0 %v2002_v54  ;;  %v1771_v54 = vld [vmem:[#allocation7 + $0x18] sm:$0xff] }
  0x7b   :  { %884 = vmatmul.bf16.vlgmr.msra.gmra.mxu3 %v2018_v37  ;;  %897 = vmatpush.bf16.msrb.mxu2 %v1507_v7  ;;  %v1770_v37 = vld [vmem:[#allocation7 + $0x10] sm:$0xff] }
  0x7c   :  { %870 = vmatmul.bf16.vlgmr.msra.gmra.mxu1 %v2006_v63  ;;  %v2032_v63 = vld [vmem:[#allocation6] sm:$0x3]  ;;  %1070 = vmatpush.bf16.msrb.mxu3 %v1783_v31 }
  0x7d   :  { %1056 = vmatpush.bf16.msrb.mxu1 %v1775_v9  ;;  %v224_v4 = vperm.slane %v2032_v63, 0  ;;  %v225_v62 = vperm.slane %v2032_v63, 1 }
  0x7e   :  { %898 = vmatmul.bf16.vlgmr.msrb.gmra.mxu2 %v2020_v44 }
  0x7f   :  { %911 = vmatpush.bf16.msra.mxu2 %v1571_v8 }
  0x80   :  { %1071 = vmatpush.bf16.msrb.mxu3 %v1782_v36 }
  0x81   :  { %1057 = vmatpush.bf16.msrb.mxu1 %v1774_v10 }
  0x84   :  { %1072 = vmatpush.bf16.msrb.mxu3 %v1781_v43 }
  0x85   :  { %1058 = vmatpush.bf16.msrb.mxu1 %v1773_v11 }
  0x88   :  { %1073 = vmatpush.bf16.msrb.mxu3 %v1780_v47 }
  0x89   :  { %1059 = vmatpush.bf16.msrb.mxu1 %v1772_v12 }
  0x8c   :  { %1074 = vmatpush.bf16.msrb.mxu3 %v1779_v51 }
  0x8d   :  { %1060 = vmatpush.bf16.msrb.mxu1 %v1771_v54 }
  0x8e   :  { %1573 = vmatmul.msk.bf16.vlgmr.msra.gmra.mxu2 %vm718_vm0, %v2014_v48 }
  0x90   :  { %1075 = vmatpush.bf16.msrb.mxu3 %v1778_v52 }
  0x91   :  { %1061 = vmatpush.bf16.msrb.mxu1 %v1770_v37 }
  0x94   :  { %1076 = vmatpush.bf16.msrb.mxu3 %v1777_v55 }
  0x95   :  { %1062 = vmatpush.bf16.msrb.mxu1 %v1769_v13 }
  0x98   :  { %1077 = vmatpush.bf16.msrb.mxu3 %v1776_v57 }
  0x99   :  { %1063 = vmatpush.bf16.msrb.mxu1 %v1768_v15 }
  0xb6   :  { %v731_v44 = vpop.f32.mrf.mxu0 }
  0xb7   :  { %v732_v16 = vadd.f32 %v731_v44, %v224_v4 }
  0xb9   :  { %v745_v48 = vpop.f32.mrf.mxu1 }
  0xba   :  { %v746_v60 = vadd.f32 %v745_v48, %v732_v16 }
  0xbd   :  { %v759_v14 = vpop.f32.mrf.mxu2 }
  0xbe   :  { %v733_v17 = vpop.f32.mrf.mxu0  ;;  %v773_v19 = vpop.f32.mrf.mxu3  ;;  %v760_v22 = vadd.f32 %v759_v14, %v746_v60 }
  0xbf   :  { %v734_v21 = vadd.f32 %v733_v17, %v224_v4 }
  0xc0   :  { %v774_v25 = vadd.f32 %v773_v19, %v760_v22  ;;  %v1791_v19 = vld [vmem:[#allocation9 + $0x38] sm:$0xff]  ;;  %v1788_v22 = vld [vmem:[#allocation9 + $0x20] sm:$0xff] }
  0xc1   :  { %v747_v20 = vpop.f32.mrf.mxu1  ;;  %1155 = vmatpush.bf16.msrb.mxu0 %v1791_v19 }
  0xc2   :  { %v748_v23 = vadd.f32 %v747_v20, %v734_v21  ;;  %v1790_v20 = vld [vmem:[#allocation9 + $0x30] sm:$0xff]  ;;  %v1789_v21 = vld [vmem:[#allocation9 + $0x28] sm:$0xff] }
  0xc5   :  { %v761_v18 = vpop.f32.mrf.mxu2  ;;  %1156 = vmatpush.bf16.msrb.mxu0 %v1790_v20 }
  0xc6   :  { %v762_v28 = vadd.f32 %v761_v18, %v748_v23  ;;  %v775_v30 = vpop.f32.mrf.mxu3  ;;  %v1787_v23 = vld [vmem:[#allocation9 + $0x18] sm:$0xff] }
  0xc8   :  { %v776_v32 = vadd.f32 %v775_v30, %v762_v28 }
  0xc9   :  { %1157 = vmatpush.bf16.msrb.mxu0 %v1789_v21 }
  0xcd   :  { %v815_v26 = vpop.f32.mrf.mxu2  ;;  %1158 = vmatpush.bf16.msrb.mxu0 %v1788_v22 }
  0xd1   :  { %1159 = vmatpush.bf16.msrb.mxu0 %v1787_v23 }
  0xd5   :  { %v817_v40 = vpop.f32.mrf.mxu2 }
  0xd6   :  { %v787_v24 = vpop.f32.mrf.mxu0 }
  0xd7   :  { %v788_v29 = vadd.f32 %v787_v24, %v774_v25  ;;  %v1786_v24 = vld [vmem:[#allocation9 + $0x10] sm:$0xff]  ;;  %v1785_v25 = vld [vmem:[#allocation9 + $0x8] sm:$0xff] }
  0xd8   :  { %1160 = vmatpush.bf16.msrb.mxu0 %v1786_v24 }
  0xd9   :  { %v801_v27 = vpop.f32.mrf.mxu1 }
  0xda   :  { %v802_v33 = vadd.f32 %v801_v27, %v788_v29  ;;  %v1808_v29 = vld [vmem:[%s2049_s4] ss:$0 sm:$0xff] }
  0xdc   :  { %v816_v39 = vadd.f32 %v815_v26, %v802_v33  ;;  %1161 = vmatpush.bf16.msrb.mxu0 %v1785_v25  ;;  %v1784_v26 = vld [vmem:[#allocation9] sm:$0xff] }
  0xde   :  { %v789_v34 = vpop.f32.mrf.mxu0  ;;  %v918_v45 = vmax.f32 %v816_v39, 0.0  ;;  %v829_v53 = vpop.f32.mrf.mxu3 }
  0xdf   :  { %v790_v35 = vadd.f32 %v789_v34, %v776_v32  ;;  %v830_v1 = vadd.f32 %v829_v53, %v225_v62 }
  0xe0   :  { %1162 = vmatpush.bf16.msrb.mxu0 %v1784_v26 }
  0xe1   :  { %v803_v38 = vpop.f32.mrf.mxu1  ;;  %v843_v50 = vpop.f32.mrf.mxu2 }
  0xe2   :  { %v804_v41 = vadd.f32 %v803_v38, %v790_v35  ;;  %v844_v6 = vadd.f32 %v843_v50, %v830_v1 }
  0xe4   :  { %v818_v42 = vadd.f32 %v817_v40, %v804_v41  ;;  %v1809_v41 = vld [vmem:[%s2051_s6] ss:$0 sm:$0xff] }
  0xe6   :  { %v920_v46 = vmax.f32 %v818_v42, 0.0  ;;  %v831_v58 = vpop.f32.mrf.mxu3 }
  0xe7   :  { %v832_v3 = vadd.f32 %v831_v58, %v225_v62 }
  0xe8   :  { %v922_v49 = vpack.c.bf16 %v920_v46, %v918_v45 }
  0xe9   :  { %v845_v56 = vpop.f32.mrf.mxu2 }
  0xea   :  { %1064 = vmatmul.bf16.vlgmr.msrb.gmra.mxu1 %v922_v49  ;;  %v846_v8 = vadd.f32 %v845_v56, %v832_v3 }
  0xf6   :  { %v857_v59 = vpop.f32.mrf.mxu0 }
  0xf7   :  { %v858_v9 = vadd.f32 %v857_v59, %v844_v6 }
  0xf9   :  { %v871_v0 = vpop.f32.mrf.mxu1 }
  0xfa   :  { %v872_v12 = vadd.f32 %v871_v0, %v858_v9 }
  0xfe   :  { %v885_v2 = vpop.f32.mrf.mxu3  ;;  %v859_v7 = vpop.f32.mrf.mxu0 }
  0xff   :  { %v860_v10 = vadd.f32 %v859_v7, %v846_v8  ;;  %v886_v13 = vadd.f32 %v885_v2, %v872_v12 }
 0x101   :  { %v899_v61 = vpop.f32.mrf.mxu2  ;;  %v873_v11 = vpop.f32.mrf.mxu1 }
 0x102   :  { %v874_v44 = vadd.f32 %v873_v11, %v860_v10  ;;  %v900_v15 = vadd.f32 %v899_v61, %v886_v13 }
 0x106   :  { %v887_v54 = vpop.f32.mrf.mxu3 }
 0x107   :  { %v888_v14 = vadd.f32 %v887_v54, %v874_v44 }
 0x109   :  { %v901_v5 = vpop.f32.mrf.mxu2 }
 0x10a   :  { %v902_v48 = vadd.f32 %v901_v5, %v888_v14 }
 0x111   :  { %v913_v37 = vpop.f32.mrf.mxu2 }
 0x112   :  { %v914_v63 = vadd.f32 %v913_v37, %v900_v15 }
 0x114   :  { %v919_v17 = vmax.f32 %v914_v63, 0.0 }
 0x119   :  { %v915_v4 = vpop.f32.mrf.mxu2 }
 0x11a   :  { %v916_v16 = vadd.f32 %v915_v4, %v902_v48 }
 0x11c   :  { %v921_v60 = vmax.f32 %v916_v16, 0.0 }
 0x11e   :  { %v923_v18 = vpack.c.bf16 %v921_v60, %v919_v17 }
 0x120   :  { %1078 = vmatmul.bf16.vlgmr.msrb.gmra.mxu3 %v923_v18 }
 0x167   :  { %v1065_v27 = vpop.f32.mrf.mxu1 }
 0x168   :  { %v1066_v31 = vadd.f32 %v1808_v29, %v1065_v27 }
 0x16f   :  { %v1067_v30 = vpop.f32.mrf.mxu1 }
 0x170   :  { %v1068_v32 = vadd.f32 %v1808_v29, %v1067_v30 }
 0x1a3   :  { %v1079_v28 = vpop.f32.mrf.mxu3 }
 0x1a4   :  { %v1080_v33 = vadd.f32 %v1079_v28, %v1066_v31 }
 0x1a6   :  { %v1084_v36 = vmax.f32 %v1080_v33, 0.0 }
 0x1ab   :  { %v1081_v34 = vpop.f32.mrf.mxu3 }
 0x1ac   :  { %v1082_v35 = vadd.f32 %v1081_v34, %v1068_v32 }
 0x1ae   :  { %v1085_v38 = vmax.f32 %v1082_v35, 0.0 }
 0x1b0   :  { %v1086_v39 = vpack.c.bf16 %v1085_v38, %v1084_v36 }
 0x1b2   :  { %1163 = vmatmul.bf16.vlgmr.msrb.gmra.mxu0 %v1086_v39 }
 0x22f   :  { %v1164_v40 = vpop.f32.mrf.mxu0 }
 0x230   :  { %v1165_v43 = vadd.f32 %v1809_v41, %v1164_v40 }
 0x237   :  { %v1166_v42 = vpop.f32.mrf.mxu0 }
 0x238   :  { %v1167_v45 = vadd.f32 %v1809_v41, %v1166_v42 }
 0x23a   :  { %v1795_v46 = vpack.c.bf16 %v1167_v45, %v1165_v43 }
 0x23c   :  { %1796 = vst [vmem:[%s2052_s7] sm:$0xff] %v1795_v46  }
 0x23d   :  { %1177 = vsyncpa [#allocation3], 1 }
 0x23e   :  { %1178 = vsyncpa [#allocation5], 1 }
 0x23f   :  { %1179 = vsyncpa [#allocation8], 1 }

</bundles_post_ra>
